<compile_context>
chip_gen: v7x
topology: tpu7x:2x2x1
jax: 0.10.0
libtpu: 0.0.40
codegen_flags: <defaults>
</compile_context>

<pallas_src>
import jax
import jax.numpy as jnp
from jax.experimental import pallas as pl
from jax.experimental.pallas import tpu as pltpu


# ----------------------------------------------------------------------------
# DDPM schedules (plain JAX glue — tiny 1-D precomputed buffers)
# ----------------------------------------------------------------------------
def ddpm_schedules(beta1, beta2, T):
    assert beta1 < beta2 < 1.0, "beta1 and beta2 must be in (0, 1)"
    beta_t = (beta2 - beta1) * jnp.arange(0, T + 1, dtype=jnp.float32) / T + beta1
    sqrt_beta_t = jnp.sqrt(beta_t)
    alpha_t = 1.0 - beta_t
    log_alpha_t = jnp.log(alpha_t)
    alphabar_t = jnp.exp(jnp.cumsum(log_alpha_t, axis=0))
    sqrtab = jnp.sqrt(alphabar_t)
    oneover_sqrta = 1.0 / jnp.sqrt(alpha_t)
    sqrtmab = jnp.sqrt(1.0 - alphabar_t)
    mab_over_sqrtmab_inv = (1.0 - alpha_t) / sqrtmab
    return {
        "alpha_t": alpha_t,
        "oneover_sqrta": oneover_sqrta,
        "sqrt_beta_t": sqrt_beta_t,
        "alphabar_t": alphabar_t,
        "sqrtab": sqrtab,
        "sqrtmab": sqrtmab,
        "mab_over_sqrtmab": mab_over_sqrtmab_inv,
    }


# ----------------------------------------------------------------------------
# Pallas kernels:  x_t = a * x + s * noise
# ----------------------------------------------------------------------------
def _affine_kernel(coef_ref, x_ref, z_ref, o_ref):
    """Noise supplied as an input stream (portable path, 3N HBM traffic)."""
    a = coef_ref[0]   # sqrtab[n_upto]
    s = coef_ref[1]   # sqrtmab[n_upto]
    o_ref[...] = (a * x_ref[...].astype(jnp.float32)
                  + s * z_ref[...].astype(jnp.float32)).astype(o_ref.dtype)


def _prng_affine_kernel(coef_ref, seed_ref, x_ref, o_ref):
    """Noise drawn on-chip with the TPU hardware PRNG (2N HBM traffic)."""
    # Mix (seed, tile index) so every grid step (and each TensorCore on v7x)
    # draws an independent, decorrelated stream.
    # TODO(synk): per-tile seeding means the noise depends on the chosen tiling;
    # use pltpu.sample_block if grid-invariant reproducibility is ever needed.
    pltpu.prng_seed(seed_ref[0], pl.program_id(0))
    z = pltpu.stateful_normal(x_ref.shape, jnp.float32)
    a = coef_ref[0]
    s = coef_ref[1]
    o_ref[...] = (a * x_ref[...].astype(jnp.float32) + s * z).astype(o_ref.dtype)


# ----------------------------------------------------------------------------
# Tiling: flatten to (rows, lane) with lane a multiple of 128, rows a multiple
# of the dtype-dependent sublane quantum; bounded row blocks, >= 2 grid steps
# when there is enough work.
# ----------------------------------------------------------------------------
_SUBLANE_MULT = {4: 8, 2: 16, 1: 32}


def _choose_tiling(n_elems, itemsize, target_bytes=4 << 20):
    sub = _SUBLANE_MULT.get(itemsize, 8)

    # Lane width: multiple of 128 (lane-dense, unmasked vst); among candidates
    # that fit at least one sublane group, pick the one with the least padding
    # (ties broken toward the wider lane).
    best = None
    for cand in (2048, 1024, 512, 256, 128):
        if cand * sub > n_elems:
            continue
        rows = pl.cdiv(n_elems, cand * sub) * sub
        pad = rows * cand - n_elems
        if best is None or pad < best[0]:
            best = (pad, cand, rows)

    if best is None:
        # Tiny tensor: a single tile whose block equals the (padded) array;
        # the (8, 128) divisibility rule does not apply to full-extent blocks.
        lane = 128
        rows = pl.cdiv(n_elems, lane)
        return lane, rows, rows

    lane, rows = best[1], best[2]

    target_rows = max(sub, target_bytes // (lane * itemsize))
    if rows >= 2 * sub:
        # Keep at least 2 grid steps so both v7x TensorCores get work.
        target_rows = min(target_rows, rows // 2)

    # Largest divisor of rows that is a multiple of `sub` and <= target_rows.
    # `sub` always qualifies, so the block never degenerates to the full array.
    rb = sub
    d = sub
    while d <= target_rows:
        if rows % d == 0:
            rb = d
        d += sub
    return lane, rows, rb


# ----------------------------------------------------------------------------
# Wrapper
# ----------------------------------------------------------------------------
def append_gaussian_noise(x, sqrtab, sqrtmab, n_upto, seed, *, noise=None,
                          use_onchip_prng=None, donate_x=False,
                          target_tile_bytes=4 << 20):
    """x: (B, C, H, W). Returns x_t with the same shape/dtype."""
    orig_shape = x.shape
    n = x.size
    itemsize = jnp.dtype(x.dtype).itemsize
    lane, rows, rb = _choose_tiling(n, itemsize, target_tile_bytes)
    n_pad = rows * lane

    # _ts = n_upto * ones(B) -> every batch row shares the same two scalars.
    coef = jnp.stack([sqrtab[n_upto], sqrtmab[n_upto]]).astype(jnp.float32)  # (2,)

    x_flat = x.reshape(-1)
    if n_pad != n:
        x_flat = jnp.pad(x_flat, (0, n_pad - n))
    x2 = x_flat.reshape(rows, lane)

    grid = (rows // rb,)
    vec_spec = pl.BlockSpec((rb, lane), lambda i: (i, 0))
    smem_spec = pl.BlockSpec(memory_space=pltpu.MemorySpace.SMEM)
    out_shape = jax.ShapeDtypeStruct((rows, lane), x.dtype)
    cparams = pltpu.CompilerParams(dimension_semantics=("parallel",))

    if use_onchip_prng is None:
        # The TPU hardware PRNG primitives only lower under the Mosaic backend.
        use_onchip_prng = (noise is None) and (jax.default_backend() == "tpu")

    if use_onchip_prng and noise is None:
        seed_arr = jnp.asarray([seed], dtype=jnp.int32)
        cost = pl.CostEstimate(flops=3 * n_pad, transcendentals=3 * n_pad,
                               bytes_accessed=2 * n_pad * itemsize)
        out = pl.pallas_call(
            _prng_affine_kernel,
            out_shape=out_shape,
            grid=grid,
            in_specs=[smem_spec, smem_spec, vec_spec],
            out_specs=vec_spec,
            compiler_params=cparams,
            cost_estimate=cost,
            input_output_aliases=({2: 0} if donate_x else {}),
        )(coef, seed_arr, x2)
    else:
        if noise is None:
            noise = jax.random.normal(jax.random.PRNGKey(seed), orig_shape,
                                      dtype=jnp.float32)
        z_flat = noise.reshape(-1).astype(x.dtype)
        if n_pad != n:
            z_flat = jnp.pad(z_flat, (0, n_pad - n))
        z2 = z_flat.reshape(rows, lane)
        cost = pl.CostEstimate(flops=3 * n_pad, transcendentals=0,
                               bytes_accessed=3 * n_pad * itemsize)
        out = pl.pallas_call(
            _affine_kernel,
            out_shape=out_shape,
            grid=grid,
            in_specs=[smem_spec, vec_spec, vec_spec],
            out_specs=vec_spec,
            compiler_params=cparams,
            cost_estimate=cost,
            input_output_aliases=({1: 0} if donate_x else {}),
        )(coef, x2, z2)

    return out.reshape(-1)[:n].reshape(orig_shape)


# ----------------------------------------------------------------------------
# Module-equivalent wrapper (matches the PyTorch forward: returns x_t only)
# ----------------------------------------------------------------------------
class AppendGaussianNoise:
    def __init__(self, betas, n_T):
        sched = ddpm_schedules(betas[0], betas[1], n_T)
        self.sqrtab = sched["sqrtab"]
        self.sqrtmab = sched["sqrtmab"]
        self.n_T = n_T

    def __call__(self, x, n_upto, seed):
        # TODO(synk): torch.randn's exact pseudo-random stream is not
        # reproducible here; the kernel draws N(0, 1) from the TPU hardware
        # PRNG (same distribution, different values).
        return append_gaussian_noise(x, self.sqrtab, self.sqrtmab, n_upto, seed)


if __name__ == "__main__":
    key = jax.random.PRNGKey(0)

    B, C, H, W = 2, 4, 16, 16
    n_T = 100
    n_upto = 7
    betas = (1e-4, 0.02)
    seed = 1234

    x = jax.random.normal(key, (B, C, H, W), dtype=jnp.float32)
    module = AppendGaussianNoise(betas, n_T)

    a = float(module.sqrtab[n_upto])
    s = float(module.sqrtmab[n_upto])

    # 1) Exact check of the fused affine against a pure-JAX reference, using a
    #    known noise tensor (this path runs on every backend).
    known_noise = jax.random.normal(jax.random.PRNGKey(42), x.shape,
                                    dtype=jnp.float32)
    x_t_known = append_gaussian_noise(x, module.sqrtab, module.sqrtmab, n_upto,
                                      seed, noise=known_noise)
    x_t_known = jax.block_until_ready(x_t_known)
    ref = a * x + s * known_noise
    assert x_t_known.shape == (B, C, H, W)
    assert jnp.allclose(x_t_known, ref, atol=1e-5, rtol=1e-5)

    # 2) Module-equivalent forward (noise drawn on-chip when running on TPU).
    x_t = module(x, n_upto, seed)
    x_t = jax.block_until_ready(x_t)
    assert x_t.shape == (B, C, H, W)

    # Statistical check: the implied noise must be ~N(0, 1).
    z_imp = (x_t - a * x) / s
    assert abs(float(jnp.mean(z_imp))) < 0.2
    assert 0.8 < float(jnp.std(z_imp)) < 1.2

    print("KERNEL_OK")
</pallas_src>

<mosaic_0001>
module attributes {stable_mosaic.version = 11 : i64} {
  func.func @_affine_kernel(%arg0: i32, %arg1: memref<2xf32, #tpu.memory_space<smem>>, %arg2: memref<8x256xf32, #tpu.memory_space<vmem>>, %arg3: memref<8x256xf32, #tpu.memory_space<vmem>>, %arg4: memref<8x256xf32, #tpu.memory_space<vmem>>) attributes {dimension_semantics = [#tpu.dimension_semantics<parallel>], iteration_bounds = array<i64: 1>, scalar_prefetch = 0 : i64, scratch_operands = 0 : i64, tpu.core_type = #tpu.core_type<tc>, window_params = [{transform_indices = @transform_0, window_bounds = array<i64: 2>}, {transform_indices = @transform_1, window_bounds = array<i64: 8, 256>}, {transform_indices = @transform_2, window_bounds = array<i64: 8, 256>}, {transform_indices = @transform_3, window_bounds = array<i64: 8, 256>}]} {
    %c0 = arith.constant 0 : index
    %0 = memref.load %arg1[%c0] : memref<2xf32, #tpu.memory_space<smem>>
    %c1 = arith.constant 1 : index
    %1 = memref.load %arg1[%c1] : memref<2xf32, #tpu.memory_space<smem>>
    %c0_0 = arith.constant 0 : index
    %c0_1 = arith.constant 0 : index
    %2 = vector.load %arg2[%c0_0, %c0_1] : memref<8x256xf32, #tpu.memory_space<vmem>>, vector<8x256xf32>
    %3 = vector.broadcast %0 : f32 to vector<8x256xf32>
    %4 = arith.mulf %3, %2 : vector<8x256xf32>
    %c0_2 = arith.constant 0 : index
    %c0_3 = arith.constant 0 : index
    %5 = vector.load %arg3[%c0_2, %c0_3] : memref<8x256xf32, #tpu.memory_space<vmem>>, vector<8x256xf32>
    %6 = vector.broadcast %1 : f32 to vector<8x256xf32>
    %7 = arith.mulf %6, %5 : vector<8x256xf32>
    %8 = arith.addf %4, %7 : vector<8x256xf32>
    %c0_4 = arith.constant 0 : index
    %c0_5 = arith.constant 0 : index
    %9 = vector.load %arg4[%c0_4, %c0_5] : memref<8x256xf32, #tpu.memory_space<vmem>>, vector<8x256xf32>
    tpu.vector_store %arg4[%c0_4, %c0_5], %8 {strides = array<i32>} : memref<8x256xf32, #tpu.memory_space<vmem>>, vector<8x256xf32>,
    return
  }
  func.func @transform_0(%arg0: i32) -> i32 {
    %c0_i32 = arith.constant 0 : i32
    %c0_i32_0 = arith.constant 0 : i32
    return %c0_i32 : i32
  }
  func.func @transform_1(%arg0: i32) -> (i32, i32) {
    %c0_i32 = arith.constant 0 : i32
    %c0_i32_0 = arith.constant 0 : i32
    return %arg0, %c0_i32 : i32, i32
  }
  func.func @transform_2(%arg0: i32) -> (i32, i32) {
    %c0_i32 = arith.constant 0 : i32
    %c0_i32_0 = arith.constant 0 : i32
    return %arg0, %c0_i32 : i32, i32
  }
  func.func @transform_3(%arg0: i32) -> (i32, i32) {
    %c0_i32 = arith.constant 0 : i32
    %c0_i32_0 = arith.constant 0 : i32
    return %arg0, %c0_i32 : i32, i32
  }
}

</mosaic_0001>

<bundles_post_ra>
// kernel: tpu_custom_call.1
= control target key start
LH: loop header
LB: loop body
LE: loop exit
PB: predicated region body
PF: predicated region fallthrough
CT: control target
= control target key end

     0   :  { %8 = vsyncpa [#allocation5], 0  ;;  %s244_s0 = inlined_call_operand.hbm [shape: f32[2], index: 0, kind: input, shape index: {}]   ;;  %s245_s1 = inlined_call_operand.hbm [shape: f32[8,256], index: 1, kind: input, shape index: {}]   ;;  %s246_s2 = inlined_call_operand.hbm [shape: f32[8,256], index: 2, kind: input, shape index: {}]   ;;  %s247_s3 = inlined_call_operand.hbm [shape: f32[8,256], index: 3, kind: output, shape index: {}]  }
   0x1   :  { %9 = vsyncpa [#allocation3], 0 }
   0x2   :  { %10 = vsyncpa [#allocation8], 0 }
   0x3   :  { %11 = vsyncpa [#allocation4], 0  ;;  %s88_s14 = scalar_lea.hbm %s244_s0, 16 }
   0x4   :  { %p89_p0 = scmp.ne.s32.totalorder %s244_s0, %s88_s14  ;;  %p92_p1 = scmp.lt.u32.totalorder %s88_s14, %s244_s0 }
   0x6   :  { %p94_p2 = pnand %p92_p1, %p89_p0 }
   0x8   :  { %97 = shalt.err (!%p94_p2)
}
   0x9   :  { %s172_s19 = smov [#allocation2]   ;;  %s173_s22 = smov [#allocation6]  }
   0xa   :  { %19 = dma.hbm_to_smem %s244_s0, 16, %s172_s19, [#allocation5]  }
   0xb   :  { %s26_s23 = sshll.u32 %s173_s22, 4  ;;  %s174_s24 = smov [#allocation7]   ;;  %s27_s23 = int_to_ptr.vmem [resolvable:$true] %s26_s23 }
   0xc   :  { %s36_s25 = sshll.u32 %s174_s24, 4  ;;  %s98_s28 = scalar_lea.hbm %s245_s1, 256  ;;  %s37_s25 = int_to_ptr.vmem [resolvable:$true] %s36_s25 }
   0xd   :  { %p99_p3 = scmp.ne.s32.totalorder %s245_s1, %s98_s28  ;;  %p102_p4 = scmp.lt.u32.totalorder %s98_s28, %s245_s1 }
   0xf   :  { %p104_p5 = pnand %p102_p4, %p99_p3 }
  0x11   :  { %107 = shalt.err (!%p104_p5)
}
  0x12   :  { %s108_s0 = scalar_lea.vmem %s27_s23, 256  ;;  %p113_p7 = scmp.lt.s32.totalorder %s27_s23, %s27_s23 }
  0x13   :  { %p109_p6 = scmp.ne.s32.totalorder %s27_s23, %s108_s0  ;;  %p114_p8 = scmp.lt.s32.totalorder %s108_s0, %s108_s0 }
  0x15   :  { %p115_p9 = por %p114_p8, %p113_p7 }
  0x17   :  { %p116_p10 = pnand %p115_p9, %p109_p6 }
  0x19   :  { %119 = shalt.err (!%p116_p10)
}
  0x1a   :  { %29 = dma.hbm_to_vmem [thread:$0]  %s245_s1, 256, %s27_s23, [#allocation3]  }
  0x1b   :  { %s120_s10 = scalar_lea.hbm %s246_s2, 256 }
  0x1c   :  { %p121_p11 = scmp.ne.s32.totalorder %s246_s2, %s120_s10  ;;  %p124_p12 = scmp.lt.u32.totalorder %s120_s10, %s246_s2 }
  0x1e   :  { %p126_p13 = pnand %p124_p12, %p121_p11 }
  0x20   :  { %129 = shalt.err (!%p126_p13)
}
  0x21   :  { %s130_s15 = scalar_lea.vmem %s37_s25, 256  ;;  %p135_p1 = scmp.lt.s32.totalorder %s37_s25, %s37_s25 }
  0x22   :  { %p131_p0 = scmp.ne.s32.totalorder %s37_s25, %s130_s15  ;;  %p136_p2 = scmp.lt.s32.totalorder %s130_s15, %s130_s15 }
  0x24   :  { %p137_p3 = por %p136_p2, %p135_p1 }
  0x26   :  { %p138_p4 = pnand %p137_p3, %p131_p0 }
  0x28   :  { %141 = shalt.err (!%p138_p4)
}
  0x29   :  { %39 = dma.hbm_to_vmem [thread:$0]  %s246_s2, 256, %s37_s25, [#allocation8]  }
  0x2a   :  { %164 = dma.done.wait [#allocation5], 16  }
  0x2b   :  { %165 = vsyncadd [#allocation5], 4294967280 }
  0x2c   :  { %166 = dma.done.wait [#allocation3], 256  }
  0x2d   :  { %167 = vsyncadd [#allocation3], 4294967040 }
  0x2e   :  { %168 = dma.done.wait [#allocation8], 256  }
  0x2f   :  { %169 = vsyncadd [#allocation8], 4294967040 }
  0x30   :  { %49 = sfence }
  0x31   :  { %s50_s17 = sld [smem:[#allocation2]]  ;;  %s83_s18 = sld [smem:[#allocation2 + $0x1]]  ;;  %v52_v0 = vld [vmem:[#allocation6] sm:$0xff]  ;;  %v57_v1 = vld [vmem:[#allocation7] sm:$0xff]  ;;  %v53_v2 = vld [vmem:[#allocation6 + $0x8] sm:$0xff] }
  0x32   :  { %v58_v3 = vld [vmem:[#allocation7 + $0x8] sm:$0xff]  ;;  %s175_s19 = smov [#allocation9]  }
  0x33   :  { %s72_s20 = sshll.u32 %s175_s19, 4  ;;  %s73_s20 = int_to_ptr.vmem [resolvable:$true] %s72_s20 }
  0x34   :  { %s142_s2 = scalar_lea.vmem %s73_s20, 256  ;;  %p147_p6 = scmp.lt.s32.totalorder %s73_s20, %s73_s20 }
  0x35   :  { %p143_p5 = scmp.ne.s32.totalorder %s73_s20, %s142_s2  ;;  %p148_p7 = scmp.lt.s32.totalorder %s142_s2, %s142_s2 }
  0x37   :  { %v54_v4 = vstv %s50_s17  ;;  %v59_v5 = vstv %s83_s18  ;;  %p149_p8 = por %p148_p7, %p147_p6 }
  0x38   :  { %v55_v6 = vmul.f32 %v54_v4, %v52_v0  ;;  %v60_v7 = vmul.f32 %v59_v5, %v57_v1  ;;  %v56_v8 = vmul.f32 %v54_v4, %v53_v2  ;;  %v61_v9 = vmul.f32 %v59_v5, %v58_v3 }
  0x39   :  { %p150_p9 = pnand %p149_p8, %p143_p5 }
  0x3a   :  { %v62_v10 = vadd.f32 %v60_v7, %v55_v6  ;;  %v63_v11 = vadd.f32 %v61_v9, %v56_v8 }
  0x3c   :  { %64 = vst [vmem:[#allocation9] sm:$0xff] %v62_v10  ;;  %65 = vst [vmem:[#allocation9 + $0x8] sm:$0xff] %v63_v11 }
  0x3d   :  { %153 = shalt.err (!%p150_p9)
}
  0x3e   :  { %s154_s23 = scalar_lea.hbm %s247_s3, 256 }
  0x3f   :  { %p155_p10 = scmp.ne.s32.totalorder %s247_s3, %s154_s23  ;;  %p158_p11 = scmp.lt.u32.totalorder %s154_s23, %s247_s3 }
  0x41   :  { %p160_p12 = pnand %p158_p11, %p155_p10 }
  0x43   :  { %163 = shalt.err (!%p160_p12)
}
  0x44   :  { %75 = dma.vmem_to_hbm [thread:$0]  %s73_s20, 256, %s247_s3, [#allocation4]  }
  0x45   :  { %170 = dma.done.wait [#allocation4], 256  }
  0x46   :  { %171 = vsyncadd [#allocation4], 4294967040 }
  0x47   :  { %79 = vsyncpa [#allocation3], 1 }
  0x48   :  { %80 = vsyncpa [#allocation8], 1 }
  0x49   :  { %81 = vsyncpa [#allocation4], 1 }
  0x4a   :  { %82 = vsyncpa [#allocation5], 1 }

</bundles_post_ra>
